<compile_context>
chip_gen: v6e
topology: v6e:2x2x1
jax: 0.10.0
libtpu: 0.0.40
codegen_flags: <defaults>
</compile_context>

<pallas_src>
import functools

import jax
import jax.numpy as jnp
from jax.experimental import pallas as pl
from jax.experimental.pallas import tpu as pltpu

_TILE_TARGET_BYTES = 4 * 1024 * 1024


def _round_up(x, m):
    return -(-x // m) * m


def _choose_tile(extent, row_bytes, align):
    """Largest `align`-aligned tile with ~_TILE_TARGET_BYTES of logits.

    Returns (tile, grid).  If the whole extent fits in one tile the block is
    the full dimension (no alignment constraint applies in that case).
    """
    by_vmem = max(align, (_TILE_TARGET_BYTES // max(row_bytes, 1)) // align * align)
    if by_vmem >= _round_up(extent, align):
        return extent, 1
    return by_vmem, pl.cdiv(extent, by_vmem)


# ---------------------------------------------------------------------------
# (N, C, S) path: classes on sublanes, spatial positions on lanes.
# ---------------------------------------------------------------------------
def _tile_loss_ncs(logits_ref, tgt_ref, *, tile_s, s_valid):
    """Per-position loss for one (C, tile_S) slab; ragged/garbage columns -> 0."""
    x = logits_ref[0].astype(jnp.float32)          # (C, TS)  classes x positions
    t = tgt_ref[0]                                 # (1, TS)  int32

    # Numerically-stable log-sum-exp over the class (sublane) axis.
    m = jnp.max(x, axis=0, keepdims=True)                            # (1, TS)
    lse = jnp.log(jnp.sum(jnp.exp(x - m), axis=0, keepdims=True)) + m

    # Gather the target-class logit via iota + masked sublane reduce.
    # TODO(synk): out-of-range targets silently select 0 (PyTorch would raise).
    cls = jax.lax.broadcasted_iota(jnp.int32, x.shape, 0)            # (C, TS)
    sel = jnp.sum(jnp.where(cls == t, x, 0.0), axis=0, keepdims=True)

    loss = lse - sel                                                 # (1, TS)

    # Mask columns past the true extent (ragged last tile reads garbage).
    col = pl.program_id(1) * tile_s + jax.lax.broadcasted_iota(
        jnp.int32, loss.shape, 1)
    return jnp.where(col < s_valid, loss, 0.0)


def _ncs_partial_sum_kernel(logits_ref, tgt_ref, out_ref, *, tile_s, s_valid):
    out_ref[...] = jnp.sum(
        _tile_loss_ncs(logits_ref, tgt_ref, tile_s=tile_s, s_valid=s_valid)
    ).reshape(1, 1, 1, 1)


def _ncs_per_elem_kernel(logits_ref, tgt_ref, out_ref, *, tile_s, s_valid):
    out_ref[0] = _tile_loss_ncs(logits_ref, tgt_ref, tile_s=tile_s, s_valid=s_valid)


# ---------------------------------------------------------------------------
# (R, C) path: rows on sublanes, classes on lanes (no transpose needed).
# ---------------------------------------------------------------------------
def _tile_loss_rc(logits_ref, tgt_ref, *, tile_r, r_valid):
    x = logits_ref[...].astype(jnp.float32)        # (TR, C)
    t = tgt_ref[...]                               # (TR, 1) int32

    m = jnp.max(x, axis=1, keepdims=True)                            # (TR, 1)
    lse = jnp.log(jnp.sum(jnp.exp(x - m), axis=1, keepdims=True)) + m

    cls = jax.lax.broadcasted_iota(jnp.int32, x.shape, 1)
    sel = jnp.sum(jnp.where(cls == t, x, 0.0), axis=1, keepdims=True)

    loss = lse - sel                                                 # (TR, 1)

    row = pl.program_id(0) * tile_r + jax.lax.broadcasted_iota(
        jnp.int32, loss.shape, 0)
    return jnp.where(row < r_valid, loss, 0.0)


def _rc_partial_sum_kernel(logits_ref, tgt_ref, out_ref, *, tile_r, r_valid):
    out_ref[...] = jnp.sum(
        _tile_loss_rc(logits_ref, tgt_ref, tile_r=tile_r, r_valid=r_valid)
    ).reshape(1, 1, 1)


def _rc_per_elem_kernel(logits_ref, tgt_ref, out_ref, *, tile_r, r_valid):
    out_ref[...] = _tile_loss_rc(logits_ref, tgt_ref, tile_r=tile_r, r_valid=r_valid)


# ---------------------------------------------------------------------------
# Wrapper matching the PyTorch CrossEntropyLoss module's forward pass.
# ---------------------------------------------------------------------------
def cross_entropy_loss(logits, target, reduction="mean"):
    vmem = 32 * 1024 * 1024

    if logits.ndim > 2:
        n, c = logits.shape[0], logits.shape[1]
        logits3d = logits.reshape(n, c, -1)                   # (N, C, S): free reshape
        tgt3d = target.reshape(n, 1, -1).astype(jnp.int32)    # (N, 1, S): lane-dense
        n_b, n_cls, s = logits3d.shape
        n_valid = n_b * s

        # TODO(synk): class-dim blocking (online LSE over a class grid axis) for
        # vocab-scale n_cls where even an (n_cls, 128) tile no longer fits VMEM.
        tile_s, grid_s = _choose_tile(s, n_cls * logits3d.dtype.itemsize, 128)

        in_specs = [
            pl.BlockSpec((1, n_cls, tile_s), lambda i, j: (i, 0, j)),
            pl.BlockSpec((1, 1, tile_s), lambda i, j: (i, 0, j)),
        ]
        compiler_params = pltpu.CompilerParams(
            dimension_semantics=("parallel", "parallel"),
            vmem_limit_bytes=vmem,
        )

        if reduction in ("mean", "sum"):
            partials = pl.pallas_call(
                functools.partial(_ncs_partial_sum_kernel, tile_s=tile_s, s_valid=s),
                out_shape=jax.ShapeDtypeStruct((n_b, grid_s, 1, 1), jnp.float32),
                grid_spec=pltpu.PrefetchScalarGridSpec(
                    num_scalar_prefetch=0,
                    grid=(n_b, grid_s),
                    in_specs=in_specs,
                    out_specs=pl.BlockSpec((1, 1, 1, 1), lambda i, j: (i, j, 0, 0)),
                ),
                compiler_params=compiler_params,
            )(logits3d, tgt3d)
            total = jnp.sum(partials)
            return total / jnp.float32(n_valid) if reduction == "mean" else total

        # 'none' (or unrecognized string): per-row losses of shape (N*S, 1),
        # exactly like the reference module's fall-through path.
        losses = pl.pallas_call(
            functools.partial(_ncs_per_elem_kernel, tile_s=tile_s, s_valid=s),
            out_shape=jax.ShapeDtypeStruct((n_b, 1, s), jnp.float32),
            grid_spec=pltpu.PrefetchScalarGridSpec(
                num_scalar_prefetch=0,
                grid=(n_b, grid_s),
                in_specs=in_specs,
                out_specs=pl.BlockSpec((1, 1, tile_s), lambda i, j: (i, 0, j)),
            ),
            compiler_params=compiler_params,
        )(logits3d, tgt3d)
        return losses.reshape(-1, 1)

    # ---- 2-D (R, C): rows on sublanes, classes on lanes, no HBM transpose ----
    r, c = logits.shape
    tgt2d = target.reshape(-1, 1).astype(jnp.int32)
    tile_r, grid_r = _choose_tile(r, c * logits.dtype.itemsize, 8)

    in_specs = [
        pl.BlockSpec((tile_r, c), lambda i: (i, 0)),
        pl.BlockSpec((tile_r, 1), lambda i: (i, 0)),
    ]
    compiler_params = pltpu.CompilerParams(
        dimension_semantics=("parallel",),
        vmem_limit_bytes=vmem,
    )

    if reduction in ("mean", "sum"):
        partials = pl.pallas_call(
            functools.partial(_rc_partial_sum_kernel, tile_r=tile_r, r_valid=r),
            out_shape=jax.ShapeDtypeStruct((grid_r, 1, 1), jnp.float32),
            grid_spec=pltpu.PrefetchScalarGridSpec(
                num_scalar_prefetch=0,
                grid=(grid_r,),
                in_specs=in_specs,
                out_specs=pl.BlockSpec((1, 1, 1), lambda i: (i, 0, 0)),
            ),
            compiler_params=compiler_params,
        )(logits, tgt2d)
        total = jnp.sum(partials)
        return total / jnp.float32(r) if reduction == "mean" else total

    losses = pl.pallas_call(
        functools.partial(_rc_per_elem_kernel, tile_r=tile_r, r_valid=r),
        out_shape=jax.ShapeDtypeStruct((r, 1), jnp.float32),
        grid_spec=pltpu.PrefetchScalarGridSpec(
            num_scalar_prefetch=0,
            grid=(grid_r,),
            in_specs=in_specs,
            out_specs=pl.BlockSpec((tile_r, 1), lambda i: (i, 0)),
        ),
        compiler_params=compiler_params,
    )(logits, tgt2d)
    return losses


# ---------------------------------------------------------------------------
# Pure-JAX reference (mirrors the PyTorch module).
# ---------------------------------------------------------------------------
def _reference(logits, target, reduction="mean"):
    if logits.ndim > 2:
        n, c = logits.shape[0], logits.shape[1]
        logits = logits.reshape(n, c, -1).transpose(0, 2, 1).reshape(-1, c)
    tgt = target.reshape(-1)
    logp = jax.nn.log_softmax(logits, axis=1)
    loss = -jnp.take_along_axis(logp, tgt[:, None], axis=1)
    if reduction == "mean":
        return loss.mean()
    if reduction == "sum":
        return loss.sum()
    return loss


if __name__ == "__main__":
    key = jax.random.PRNGKey(0)
    k1, k2, k3, k4 = jax.random.split(key, 4)

    # Small NCHW logits + integer class targets, like a segmentation loss.
    batch, channels, h, w = 2, 4, 16, 16
    logits = jax.random.normal(k1, (batch, channels, h, w), dtype=jnp.float32)
    target = jax.random.randint(k2, (batch, h, w), 0, channels, dtype=jnp.int32)

    loss_mean = jax.block_until_ready(cross_entropy_loss(logits, target, "mean"))
    ref_mean = _reference(logits, target, "mean")
    assert jnp.allclose(loss_mean, ref_mean, atol=1e-5, rtol=1e-5), (loss_mean, ref_mean)

    loss_sum = jax.block_until_ready(cross_entropy_loss(logits, target, "sum"))
    ref_sum = _reference(logits, target, "sum")
    assert jnp.allclose(loss_sum, ref_sum, atol=1e-4, rtol=1e-5), (loss_sum, ref_sum)

    loss_none = jax.block_until_ready(cross_entropy_loss(logits, target, "none"))
    ref_none = _reference(logits, target, "none")
    assert loss_none.shape == ref_none.shape, (loss_none.shape, ref_none.shape)
    assert jnp.allclose(loss_none, ref_none, atol=1e-5, rtol=1e-5)

    # 2-D (R, C) path: classifier-style logits, includes a ragged row count.
    rows, n_cls2 = 60, 10
    logits2 = jax.random.normal(k3, (rows, n_cls2), dtype=jnp.float32)
    target2 = jax.random.randint(k4, (rows,), 0, n_cls2, dtype=jnp.int32)

    l2_mean = jax.block_until_ready(cross_entropy_loss(logits2, target2, "mean"))
    r2_mean = _reference(logits2, target2, "mean")
    assert jnp.allclose(l2_mean, r2_mean, atol=1e-5, rtol=1e-5), (l2_mean, r2_mean)

    l2_none = jax.block_until_ready(cross_entropy_loss(logits2, target2, "none"))
    r2_none = _reference(logits2, target2, "none")
    assert l2_none.shape == r2_none.shape, (l2_none.shape, r2_none.shape)
    assert jnp.allclose(l2_none, r2_none, atol=1e-5, rtol=1e-5)

    print("KERNEL_OK")
</pallas_src>

<mosaic_0001>
module attributes {stable_mosaic.version = 11 : i64} {
  func.func @_ncs_partial_sum_kernel(%arg0: i32, %arg1: i32, %arg2: memref<1x4x256xf32, #tpu.memory_space<vmem>>, %arg3: memref<1x1x256xi32, #tpu.memory_space<vmem>>, %arg4: memref<1x1x1x1xf32, #tpu.memory_space<vmem>>) attributes {dimension_semantics = [#tpu.dimension_semantics<parallel>, #tpu.dimension_semantics<parallel>], iteration_bounds = array<i64: 2, 1>, scalar_prefetch = 0 : i64, scratch_operands = 0 : i64, tpu.core_type = #tpu.core_type<tc>, window_params = [{transform_indices = @transform_0, window_bounds = array<i64: 1, 4, 256>}, {transform_indices = @transform_1, window_bounds = array<i64: 1, 1, 256>}, {transform_indices = @transform_2, window_bounds = array<i64: 1, 1, 1, 1>}]} {
    %c0 = arith.constant 0 : index
    %c0_0 = arith.constant 0 : index
    %c0_1 = arith.constant 0 : index
    %0 = vector.load %arg2[%c0, %c0_0, %c0_1] : memref<1x4x256xf32, #tpu.memory_space<vmem>>, vector<1x4x256xf32>
    %1 = vector.shape_cast %0 : vector<1x4x256xf32> to vector<4x256xf32>
    %c0_2 = arith.constant 0 : index
    %c0_3 = arith.constant 0 : index
    %c0_4 = arith.constant 0 : index
    %2 = vector.load %arg3[%c0_2, %c0_3, %c0_4] : memref<1x1x256xi32, #tpu.memory_space<vmem>>, vector<1x1x256xi32>
    %3 = vector.shape_cast %2 : vector<1x1x256xi32> to vector<1x256xi32>
    %cst = arith.constant dense<0xFF800000> : vector<256xf32>
    %4 = vector.multi_reduction <maximumf>, %1, %cst [0] : vector<4x256xf32> to vector<256xf32>
    %5 = vector.shape_cast %4 : vector<256xf32> to vector<1x256xf32>
    %6 = vector.broadcast %5 : vector<1x256xf32> to vector<4x256xf32>
    %7 = arith.subf %1, %6 : vector<4x256xf32>
    %8 = math.exp %7 : vector<4x256xf32>
    %cst_5 = arith.constant dense<0.000000e+00> : vector<256xf32>
    %9 = vector.multi_reduction <add>, %8, %cst_5 [0] : vector<4x256xf32> to vector<256xf32>
    %10 = vector.shape_cast %9 : vector<256xf32> to vector<1x256xf32>
    %11 = math.log %10 : vector<1x256xf32>
    %12 = arith.addf %11, %5 : vector<1x256xf32>
    %13 = tpu.iota {dimensions = array<i32: 0>} : vector<4x256xi32>
    %14 = vector.broadcast %3 : vector<1x256xi32> to vector<4x256xi32>
    %15 = arith.cmpi eq, %13, %14 : vector<4x256xi32>
    %cst_6 = arith.constant 0.000000e+00 : f32
    %16 = vector.broadcast %cst_6 : f32 to vector<4x256xf32>
    %17 = arith.select %15, %1, %16 : vector<4x256xi1>, vector<4x256xf32>
    %cst_7 = arith.constant dense<0.000000e+00> : vector<256xf32>
    %18 = vector.multi_reduction <add>, %17, %cst_7 [0] : vector<4x256xf32> to vector<256xf32>
    %19 = vector.shape_cast %18 : vector<256xf32> to vector<1x256xf32>
    %20 = arith.subf %12, %19 : vector<1x256xf32>
    %c256_i32 = arith.constant 256 : i32
    %21 = arith.muli %arg1, %c256_i32 : i32
    %22 = tpu.iota {dimensions = array<i32: 1>} : vector<1x256xi32>
    %23 = vector.broadcast %21 : i32 to vector<1x256xi32>
    %24 = arith.addi %23, %22 : vector<1x256xi32>
    %c256_i32_8 = arith.constant 256 : i32
    %25 = vector.broadcast %c256_i32_8 : i32 to vector<1x256xi32>
    %26 = arith.cmpi slt, %24, %25 : vector<1x256xi32>
    %cst_9 = arith.constant 0.000000e+00 : f32
    %27 = vector.broadcast %cst_9 : f32 to vector<1x256xf32>
    %28 = arith.select %26, %20, %27 : vector<1x256xi1>, vector<1x256xf32>
    %29 = vector.shape_cast %28 : vector<1x256xf32> to vector<1x1x256xf32>
    %cst_10 = arith.constant dense<0.000000e+00> : vector<1xf32>
    %30 = vector.multi_reduction <add>, %29, %cst_10 [1, 2] : vector<1x1x256xf32> to vector<1xf32>
    %31 = vector.shape_cast %30 : vector<1xf32> to vector<1x1x1xf32>
    %32 = vector.extract %31[0, 0, 0] : f32 from vector<1x1x1xf32>
    %33 = vector.broadcast %32 : f32 to vector<1x1x1x1xf32>
    %c0_11 = arith.constant 0 : index
    %c0_12 = arith.constant 0 : index
    %c0_13 = arith.constant 0 : index
    %c0_14 = arith.constant 0 : index
    %34 = vector.load %arg4[%c0_11, %c0_12, %c0_13, %c0_14] : memref<1x1x1x1xf32, #tpu.memory_space<vmem>>, vector<1x1x1x1xf32>
    tpu.vector_store %arg4[%c0_11, %c0_12, %c0_13, %c0_14], %33 {strides = array<i32>} : memref<1x1x1x1xf32, #tpu.memory_space<vmem>>, vector<1x1x1x1xf32>,
    return
  }
  func.func @transform_0(%arg0: i32, %arg1: i32) -> (i32, i32, i32) {
    %c0_i32 = arith.constant 0 : i32
    %c0_i32_0 = arith.constant 0 : i32
    return %arg0, %c0_i32, %arg1 : i32, i32, i32
  }
  func.func @transform_1(%arg0: i32, %arg1: i32) -> (i32, i32, i32) {
    %c0_i32 = arith.constant 0 : i32
    %c0_i32_0 = arith.constant 0 : i32
    return %arg0, %c0_i32, %arg1 : i32, i32, i32
  }
  func.func @transform_2(%arg0: i32, %arg1: i32) -> (i32, i32, i32, i32) {
    %c0_i32 = arith.constant 0 : i32
    %c0_i32_0 = arith.constant 0 : i32
    %c0_i32_1 = arith.constant 0 : i32
    return %arg0, %arg1, %c0_i32, %c0_i32_0 : i32, i32, i32, i32
  }
}

</mosaic_0001>

<bundles_post_ra>
// kernel: tpu_custom_call.1
= control target key start
LH: loop header
LB: loop body
LE: loop exit
PB: predicated region body
PF: predicated region fallthrough
CT: control target
= control target key end

     0   :  { %7 = vsyncpa [#allocation3], 0  ;;  %s788_s0 = inlined_call_operand.hbm [shape: f32[2,4,256], index: 0, kind: input, shape index: {}]   ;;  %s789_s1 = inlined_call_operand.hbm [shape: s32[2,1,256], index: 1, kind: input, shape index: {}]   ;;  %s790_s2 = inlined_call_operand.vmem [shape: f32[2,1,1,1], index: 2, kind: output, shape index: {}]  }
   0x1   :  { %9 = vsyncpa [#allocation3 + $0x1], 0 }
   0x2   :  { %10 = vsyncpa [#allocation5], 0 }
   0x3   :  { %12 = vsyncpa [#allocation5 + $0x1], 0  ;;  %s654_s9 = smov 0   ;;  %s656_s10 = smov 0  }
   0x4   :  { %s658_s11 = smov 0   ;;  %s660_s12 = smov 0  }
   0x5   :  { %s662_s13 = smov 0   ;;  %s664_s14 = smov 0  }
   0x6 LB: > { %s439_s15 = sadd.s32 4294967295, %s635_s14   ;;  %s30_s16 = sadd.s32 1, %s631_s13  ;;  %s635_s14 = sphi %s664_s14, %s18_s14   ;;  %s631_s13 = sphi %s662_s13, %s799_s13   ;;  %s627_s12 = sphi %s660_s12, %s798_s12   ;;  %s623_s11 = sphi %s658_s11, %s797_s11   ;;  %s619_s10 = sphi %s656_s10, %s796_s10   ;;  %s615_s9 = sphi %s654_s9, %s795_s9  }
   0x7   : > { %p32_p0 = scmp.ge.s32.totalorder %s30_s16, 2  ;;  %s39_s17 = sadd.s32 1, %s623_s11 }
   0x8   : > { %p46_p1 = scmp.ne.s32.totalorder %s623_s11, %s619_s10  ;;  %p47_p2 = scmp.eq.s32.totalorder %s635_s14, 0 }
   0x9   : > { %s801_s16 = smov (%p32_p0, %s30_s16), 0  ;;  %p52_p4 = scmp.ne.s32.totalorder %s619_s10, %s615_s9 }
   0xa   : > { %p690_p3 = por %p47_p2, %p46_p1  ;;  %s34_s19 = ssub.s32 %s631_s13, %s801_s16 }
   0xb   : > { %p53_p5 = scmp.eq.s32.totalorder %s439_s15, 0  ;;  %p37_p6 = scmp.eq.s32.totalorder %s34_s19, 0 }
   0xc   : > { %p469_p8 = scmp.lt.s32.totalorder %s635_s14, 2  ;;  %s706_s22 = sand.u32 1, %s623_s11  }
   0xd   : > { %p697_p7 = por %p53_p5, %p52_p4  ;;  %s454_s23 = sshll.u32 %s631_s13, 7 }
   0xe   : > { %s703_s21 = scalar_select %p37_p6, %s623_s11, %s39_s17  }
   0xf   : > { %s443_s24 = sshll.u32 %s706_s22, 3  ;;  %s144_s27 = scalar_lea.hbm %s788_s0, %s454_s23 }
  0x10   : > { %s136_s28 = scalar_lea.vmem [#allocation2], %s443_s24  ;;  %p715_p9 = pnand %p469_p8, %p690_p3 }
  0x11   : > { %s146_s29 = sshll.u32 %s136_s28, 4  ;;  %p449_p10 = scmp.ge.s32.totalorder %s635_s14, 1  ;;  %s147_s29 = int_to_ptr.vmem [resolvable:$true] %s146_s29 }
  0x12   : > { %p172_p11 = scmp.lt.s32.totalorder %s635_s14, 3  ;;  %s133_s3 = scalar_lea.sflag [#allocation3], %s706_s22 }
  0x13   : > { %p527_p12 = pneg %p715_p9  ;;  %s538_s4 = scalar_lea.vmem %s147_s29, 128 }
  0x14   : > { %p539_p13 = scmp.ne.s32.totalorder %s147_s29, %s538_s4  ;;  %s637_s5 = smov [#allocation2]  }
  0x15   : > { %s543_s6 = sshll.u32 %s637_s5, 4  ;;  %s544_s6 = int_to_ptr.vmem [resolvable:$false] %s543_s6 }
  0x16   : > { %p541_p0 = pnand %p539_p13, %p527_p12  ;;  %s545_s7 = scalar_lea.vmem %s544_s6, 256 }
  0x17   : > { %p546_p2 = scmp.lt.s32.totalorder %s147_s29, %s544_s6  ;;  %p547_p3 = scmp.lt.s32.totalorder %s545_s7, %s538_s4 }
  0x18   : > { %p542_p1 = pneg %p541_p0 }
  0x19   : > { %p548_p4 = por %p547_p3, %p546_p2 }
  0x1b   : > { %p549_p5 = pnand %p548_p4, %p542_p1 }
  0x1d   : > { %552 = shalt.err (!%p549_p5)
}
  0x1e   : > { %465 = dma.hbm_to_vmem [thread:$0]  (!%p715_p9), %s144_s27, 128, %s147_s29, %s133_s3  }
  0x1f   : > { %p733_p6 = pnand %p449_p10, %p172_p11  ;;  %s446_s9 = sshll.u32 %s706_s22, 1 }
  0x20   : > { %s455_s15 = sshll.u32 %s631_s13, 5  ;;  %s157_s23 = scalar_lea.vmem [#allocation4], %s446_s9 }
  0x21   : > { %s165_s19 = scalar_lea.hbm %s789_s1, %s455_s15  ;;  %s167_s24 = sshll.u32 %s157_s23, 4  ;;  %s168_s24 = int_to_ptr.vmem [resolvable:$true] %s167_s24 }
  0x22   : > { %s154_s25 = scalar_lea.sflag [#allocation5], %s706_s22  ;;  %s566_s26 = scalar_lea.vmem %s168_s24, 32 }
  0x23   : > { %p567_p8 = scmp.ne.s32.totalorder %s168_s24, %s566_s26  ;;  %s638_s27 = smov [#allocation4]  }
  0x24   : > { %s571_s28 = sshll.u32 %s638_s27, 4  ;;  %s572_s28 = int_to_ptr.vmem [resolvable:$false] %s571_s28 }
  0x25   : > { %p569_p13 = pnand %p567_p8, %p527_p12  ;;  %s573_s29 = scalar_lea.vmem %s572_s28, 64 }
  0x26   : > { %p574_p10 = scmp.lt.s32.totalorder %s168_s24, %s572_s28  ;;  %p575_p11 = scmp.lt.s32.totalorder %s573_s29, %s566_s26 }
  0x27   : > { %p570_p0 = pneg %p569_p13 }
  0x28   : > { %p576_p1 = por %p575_p11, %p574_p10 }
  0x2a   : > { %p577_p2 = pnand %p576_p1, %p570_p0 }
  0x2c   : > { %580 = shalt.err (!%p577_p2)
}
  0x2d   : > { %468 = dma.hbm_to_vmem [thread:$0]  (!%p715_p9), %s165_s19, 32, %s168_s24, %s154_s25  }
  0x2e   : > { %176 = sbr.rel (%p733_p6) target bundleno = 331 (0x14b), region = 28  ;;  %s178_s22 = sand.u32 (!%p733_p6), 1, %s619_s10  }
  0x2f   : > { %s450_s3 = sshll.u32 (!%p733_p6), %s178_s22, 3  ;;  %s179_s4 = scalar_lea.sflag (!%p733_p6), [#allocation3], %s178_s22 }
  0x30   : > { %s182_s5 = scalar_lea.vmem (!%p733_p6), [#allocation2], %s450_s3 }
  0x33   : > { %606 = dma.done.wait (%p697_p7), %s179_s4, 128  }
  0x34   : > { %608 = vsyncadd (%p697_p7), %s179_s4, 4294967168  ;;  %s451_s6 = sshll.u32 %s178_s22, 1  ;;  %s188_s7 = scalar_lea.sflag [#allocation5], %s178_s22 }
  0x35   : > { %s191_s9 = scalar_lea.vmem [#allocation4], %s451_s6 }
  0x36   : > { %610 = dma.done.wait (%p697_p7), %s188_s7, 32  }
  0x37   : > { %612 = vsyncadd (%p697_p7), %s188_s7, 4294967264  ;;  %vm231_vm0 = vcmask 1043456   ;;  %v226_v0 = vld [vmem:[%s182_s5] sm:$0xff]  ;;  %v276_v18 = vlaneseq  ;;  %v227_v22 = vld [vmem:[%s191_s9] sm:$0x3]  ;;  %vm317_vm3 = vcmask 1040384  }
  0x38   : > { %v229_v1 = vcombine.high %v226_v0, %v226_v0  ;;  %v232_v2 = vsel %vm231_vm0, %v226_v0, -inf  ;;  %p220_p7 = scmp.lt.s32.totalorder %s627_s12, 1  ;;  %vm331_vm4 = vcmask 0  }
  0x39   : > { %v233_v3 = vrot.slane %v232_v2, 4  ;;  %v277_v20 = vshrl.u32 %v276_v18, 7 }
  0x3a   : > { %v239_v4 = vsel %vm231_vm0, %v229_v1, -inf  ;;  %s803_s12 = smov (!%p220_p7, %s627_s12), 1 }
  0x3b   : > { %v234_v5 = vmax.f32 %v232_v2, %v233_v3  ;;  %v240_v6 = vrot.slane %v239_v4, 4  ;;  %v280_v21 = vsub.s32 0, %v277_v20  ;;  %v284_v23 = vsub.s32 1, %v277_v20  ;;  %s225_s8 = scalar_lea.vmem %s790_s2, %s803_s12 }
  0x3d   : > { %v235_v7 = vrot.slane %v234_v5, 2  ;;  %v241_v8 = vmax.f32 %v239_v4, %v240_v6  ;;  %v281_v24 = vrot.slane %v227_v22, %v280_v21  ;;  %v285_v25 = vrot.slane %v227_v22, %v284_v23 }
  0x3f   : > { %v236_v9 = vmax.f32 %v234_v5, %v235_v7  ;;  %v242_v10 = vrot.slane %v241_v8, 2  ;;  %vm286_vm1 = vcmp.eq.s32.totalorder %v277_v20, %v281_v24  ;;  %vm287_vm2 = vcmp.eq.s32.totalorder %v277_v20, %v285_v25 }
  0x40   : > { %v288_v30 = vsel %vm286_vm1, %v226_v0, 0.0  ;;  %v289_v34 = vsel %vm287_vm2, %v229_v1, 0.0 }
  0x41   : > { %v237_v11 = vrot.slane %v236_v9, 1  ;;  %v243_v12 = vmax.f32 %v241_v8, %v242_v10  ;;  %v290_v35 = vsel %vm231_vm0, %v288_v30, 0.0  ;;  %v297_v38 = vsel %vm231_vm0, %v289_v34, 0.0 }
  0x42   : > { %v291_v41 = vrot.slane %v290_v35, 4  ;;  %v298_v44 = vrot.slane %v297_v38, 4 }
  0x43   : > { %v238_v13 = vmax.f32 %v236_v9, %v237_v11  ;;  %v244_v14 = vrot.slane %v243_v12, 1 }
  0x44   : > { %v292_v47 = vadd.f32 %v291_v41, %v290_v35  ;;  %v299_v49 = vadd.f32 %v298_v44, %v297_v38 }
  0x45   : > { %v245_v15 = vmax.f32 %v243_v12, %v244_v14 }
  0x46   : > { %v293_v50 = vrot.slane %v292_v47, 2  ;;  %v300_v51 = vrot.slane %v299_v49, 2 }
  0x47   : > { %v248_v16 = vcombine.low %v238_v13, %v245_v15 }
  0x48   : > { %v294_v52 = vadd.f32 %v293_v50, %v292_v47  ;;  %v301_v53 = vadd.f32 %v300_v51, %v299_v49 }
  0x49   : > { %v250_v17 = vsub.f32 %v226_v0, %v248_v16 }
  0x4a   : > { %v295_v54 = vrot.slane %v294_v52, 1  ;;  %v302_v55 = vrot.slane %v301_v53, 1 }
  0x4b   : > { %v251_v19 = vmul.f32 1.442695, %v250_v17 }
  0x4c   : > { %v296_v58 = vadd.f32 %v295_v54, %v294_v52  ;;  %v303_v62 = vadd.f32 %v302_v55, %v301_v53 }
  0x4d   : > { %519 = vpow2.f32 %v251_v19 }
  0x5a   : > { %v520_v26 = vpop.eup %519 }
  0x5b   : > { %v254_v27 = vcombine.high %v520_v26, %v520_v26  ;;  %v256_v28 = vsel %vm231_vm0, %v520_v26, 0.0 }
  0x5c   : > { %v257_v29 = vrot.slane %v256_v28, 4 }
  0x5d   : > { %v263_v31 = vsel %vm231_vm0, %v254_v27, 0.0 }
  0x5e   : > { %v258_v32 = vadd.f32 %v257_v29, %v256_v28  ;;  %v264_v33 = vrot.slane %v263_v31, 4 }
  0x60   : > { %v259_v36 = vrot.slane %v258_v32, 2  ;;  %v265_v37 = vadd.f32 %v264_v33, %v263_v31 }
  0x62   : > { %v260_v39 = vadd.f32 %v259_v36, %v258_v32  ;;  %v266_v40 = vrot.slane %v265_v37, 2 }
  0x64   : > { %v261_v42 = vrot.slane %v260_v39, 1  ;;  %v267_v43 = vadd.f32 %v266_v40, %v265_v37 }
  0x66   : > { %v262_v45 = vadd.f32 %v261_v42, %v260_v39  ;;  %v268_v46 = vrot.slane %v267_v43, 1 }
  0x68   : > { %v269_v48 = vadd.f32 %v268_v46, %v267_v43  ;;  %521 = vlog2.f32 %v262_v45 }
  0x6a   : > { %523 = vlog2.f32 %v269_v48 }
  0x75   : > { %v522_v56 = vpop.eup %521 }
  0x76   : > { %v271_v57 = vmul.f32 0.6931472, %v522_v56 }
  0x77   : > { %v524_v59 = vpop.eup %523 }
  0x78   : > { %v273_v60 = vmul.f32 0.6931472, %v524_v59  ;;  %v274_v61 = vadd.f32 %v271_v57, %v238_v13 }
  0x7a   : > { %v275_v63 = vadd.f32 %v273_v60, %v245_v15  ;;  %v304_v0 = vsub.f32 %v274_v61, %v296_v58 }
  0x7c   : > { %v305_v1 = vsub.f32 %v275_v63, %v303_v62  ;;  %v318_v2 = vsel %vm317_vm3, %v304_v0, 0.0 }
  0x7e   : > { %v319_v3 = vsel %vm317_vm3, %v305_v1, 0.0 }
  0x7f   : > { %v320_v4 = vadd.f32 %v319_v3, %v318_v2 }
  0x81   : > { %321 = vadd.xlane.f32.xlu0 %v320_v4 }
 0x10a   : > { %v322_v5 = vpop.xlane.xlu0 %321 }
 0x10b   : > { %v323_v6 = vrot.slane %v322_v5, 4 }
 0x10d   : > { %v324_v7 = vadd.f32 %v323_v6, %v322_v5 }
 0x10f   : > { %v325_v8 = vrot.slane %v324_v7, 2 }
 0x111   : > { %v326_v9 = vadd.f32 %v325_v8, %v324_v7 }
 0x113   : > { %v327_v10 = vrot.slane %v326_v9, 1 }
 0x115   : > { %v328_v11 = vadd.f32 %v327_v10, %v326_v9 }
 0x117   : > { %456 = vpush %v328_v11 }
 0x148   : > { %s457_s15 = spop %456 }
 0x149   : > { %v330_v12 = vstv %s457_s15 }
 0x14a   : > { %332 = vst.msk [vmem:[%s225_s8] sm:$0x1] %vm331_vm4, %v330_v12 }
 0x14b PF: > { %s18_s14 = sadd.s32 1, %s635_s14   ;;  %s795_s9 = smov %s619_s10 }
 0x14c   : > { %p15_p9 = scmp.ge.s32.totalorder %s18_s14, 4   ;;  %s796_s10 = smov %s623_s11 }
 0x14d   : > { %s797_s11 = smov %s703_s21  ;;  %s798_s12 = smov %s631_s13 }
 0x14e   : > { %s799_s13 = smov %s801_s16  ;;  %17 = sbr.rel (!%p15_p9) target bundleno = 6 (0x6), region = 81 }
 0x153   :  { %356 = vsyncpa [#allocation3], 1 }
 0x154   :  { %358 = vsyncpa [#allocation3 + $0x1], 1 }
 0x155   :  { %359 = vsyncpa [#allocation5], 1 }
 0x156   :  { %361 = vsyncpa [#allocation5 + $0x1], 1 }

</bundles_post_ra>
